<compile_context>
chip_gen: v7x
topology: tpu7x:2x2x1
jax: 0.10.0
libtpu: 0.0.40
codegen_flags: <defaults>
</compile_context>

<pallas_src>
import jax
import jax.numpy as jnp
from jax import lax
from jax.experimental import pallas as pl
from jax.experimental.pallas import tpu as pltpu


# ---------------------------------------------------------------------------
# sizing helpers
# ---------------------------------------------------------------------------
def _round_up(x, m):
    return (x + m - 1) // m * m


def _vmem_capacity_bytes():
    try:
        return int(pltpu.get_tpu_info().vmem_capacity_bytes)
    except Exception:
        return 64 * 1024 * 1024          # conservative (v7x per-TC VMEM)


def _choose_t_tile(T, C, F, itemsize, target_bytes):
    """T tile for the (1, C, tT, F) streaming blocks.

    zt/gate blocks are (1, C, tT), so tT must be a multiple of 128 or == T.
    Partial last tiles (T % tT != 0) are handled by Pallas masking.
    """
    if C * T * F * itemsize <= target_bytes:
        return T
    tt = (target_bytes // max(C * F * itemsize, 1)) // 128 * 128
    tt = max(tt, 128)
    return min(tt, T)


def _choose_batch_block(B, per_row_bytes, budget_bytes):
    """Returns (Bb, B_pad): batch block (multiple of 8) and padded batch (Bb | B_pad)."""
    b8 = _round_up(max(B, 1), 8)
    max_bb = max(8, (budget_bytes // max(per_row_bytes, 1)) // 8 * 8)
    bb = min(b8, max_bb)
    if b8 >= 16:                          # keep >= 2 blocks so v7x's 2 TCs both work
        bb = min(bb, _round_up(-(-b8 // 2), 8))
    return bb, _round_up(b8, bb)


# ---------------------------------------------------------------------------
# Kernel 1: zt[b, c, t] = mean_f x[b, c, t, f]   (grid over (B, T-tiles))
# ---------------------------------------------------------------------------
def _zt_kernel(x_ref, zt_ref):
    x = x_ref[0].astype(jnp.float32)              # (C, tT, F)
    zt_ref[0] = jnp.mean(x * x, axis=-1)          # (C, tT): lane-dense store


# ---------------------------------------------------------------------------
# Kernel 2: GRU + att_fc + temporal convs -> gate (T, Bb, C)
#           (grid over batch blocks; whole recurrence per block)
# ---------------------------------------------------------------------------
def _gate_kernel(zt_ref,
                 w_i, w_h, b_i, b_hn, fc_w, fc_b,
                 c1_w, c1_b, c2_w, c2_b, pre_a,
                 gate_ref,
                 gi_s, hs_s, at_s, y1_s):
    T, Bb, C = zt_ref.shape
    Hp = w_h.shape[1] // 3                         # 128-lane aligned hidden width
    TB = T * Bb
    Co = y1_s.shape[1]

    # Fused input projection for all (t, b) rows: one (TB, C) x (C, 3Hp) matmul
    # (bf16 inputs, f32 accumulation).
    zt = zt_ref[...].reshape(TB, C).astype(jnp.bfloat16)
    gi = jnp.dot(zt, w_i[...], preferred_element_type=jnp.float32) + b_i[...]
    gi_s[...] = gi.astype(gi_s.dtype)

    w_h_v = w_h[...]                               # (Hp, 3Hp) f32, loaded once
    b_hn_v = b_hn[...]                             # (1, Hp)   f32

    def gru_step(t, h):                            # h: (Bb, Hp) f32
        r0 = pl.multiple_of(t * Bb, 8)
        gi_t = gi_s[pl.ds(r0, Bb), :].astype(jnp.float32)             # (Bb, 3Hp)
        gh = jnp.dot(h, w_h_v, preferred_element_type=jnp.float32)    # (Bb, 3Hp)
        # r|z|n blocks start at 128-lane multiples (0, Hp, 2Hp).
        r = jax.nn.sigmoid(gi_t[:, 0:Hp] + gh[:, 0:Hp])
        z = jax.nn.sigmoid(gi_t[:, Hp:2 * Hp] + gh[:, Hp:2 * Hp])
        n = jnp.tanh(gi_t[:, 2 * Hp:3 * Hp] + r * (gh[:, 2 * Hp:3 * Hp] + b_hn_v))
        h_new = (1.0 - z) * n + z * h
        hs_s[pl.ds(r0, Bb), :] = h_new.astype(hs_s.dtype)
        return h_new

    lax.fori_loop(0, T, gru_step, jnp.zeros((Bb, Hp), jnp.float32), unroll=2)

    # att_fc + sigmoid hoisted out of the recurrence: one (TB, Hp) x (Hp, C) dot.
    at = jax.nn.sigmoid(
        jnp.dot(hs_s[...], fc_w[...], preferred_element_type=jnp.float32)
        + fc_b[...])                               # (TB, C) f32

    # conv1 over T (kernel 3, padding 1, cross-correlation) + PReLU.
    # Padded buffer has Bb zero rows on each side; tap k reads row offset k*Bb
    # (Bb % 8 == 0 -> sublane aligned).  Only the pad rows are zeroed.
    at_s[0:Bb, :] = jnp.zeros((Bb, C), jnp.float32)
    at_s[(T + 1) * Bb:(T + 2) * Bb, :] = jnp.zeros((Bb, C), jnp.float32)
    at_s[Bb:Bb + TB, :] = at
    at_bf = at.astype(jnp.bfloat16)
    acc1 = jnp.dot(at_s[0:TB, :].astype(jnp.bfloat16), c1_w[0],
                   preferred_element_type=jnp.float32)
    acc1 = acc1 + jnp.dot(at_bf, c1_w[1], preferred_element_type=jnp.float32)
    acc1 = acc1 + jnp.dot(at_s[2 * Bb:2 * Bb + TB, :].astype(jnp.bfloat16), c1_w[2],
                          preferred_element_type=jnp.float32)
    y1 = acc1 + c1_b[...]                          # (TB, Co)
    alpha = pre_a[0]                               # PReLU slope (SMEM scalar)
    y1 = jnp.where(y1 >= 0.0, y1, alpha * y1)

    # conv2 over T (kernel 3, padding 1) + sigmoid.
    y1_s[0:Bb, :] = jnp.zeros((Bb, Co), jnp.float32)
    y1_s[(T + 1) * Bb:(T + 2) * Bb, :] = jnp.zeros((Bb, Co), jnp.float32)
    y1_s[Bb:Bb + TB, :] = y1
    y1_bf = y1.astype(jnp.bfloat16)
    acc2 = jnp.dot(y1_s[0:TB, :].astype(jnp.bfloat16), c2_w[0],
                   preferred_element_type=jnp.float32)
    acc2 = acc2 + jnp.dot(y1_bf, c2_w[1], preferred_element_type=jnp.float32)
    acc2 = acc2 + jnp.dot(y1_s[2 * Bb:2 * Bb + TB, :].astype(jnp.bfloat16), c2_w[2],
                          preferred_element_type=jnp.float32)
    fdta = jax.nn.sigmoid(acc2 + c2_b[...])        # (TB, C)

    gate_ref[...] = (at * fdta).reshape(T, Bb, C)


# ---------------------------------------------------------------------------
# Kernel 3: out = x * gate   (gate broadcast over F; grid over (B, T-tiles))
# ---------------------------------------------------------------------------
def _apply_kernel(x_ref, g_ref, out_ref):
    g = g_ref[0]                                   # (C, tT): lane-dense load
    x = x_ref[...].astype(jnp.float32)
    out_ref[...] = (x * g[None, :, :, None]).astype(out_ref.dtype)


# ---------------------------------------------------------------------------
# Wrapper
# ---------------------------------------------------------------------------
def ctfa_forward(x_nchw, p):
    """cTFA forward.  x_nchw: (B, C, T, F) (NCHW).  Returns same shape/dtype."""
    x = x_nchw                                     # keep native dtype (no eager upcast)
    B, C, T, F = x.shape
    H = 2 * C
    Co = p["conv1_w"].shape[0]
    Hp = _round_up(H, 128)                         # 128-lane aligned gate blocks
    itemsize = x.dtype.itemsize

    vmem_cap = _vmem_capacity_bytes()
    target_tile = (8 << 20) if vmem_cap >= (96 << 20) else (4 << 20)
    tT = _choose_t_tile(T, C, F, itemsize, target_tile)
    nT = -(-T // tT)

    # Gate-kernel batch blocking from a VMEM budget (scratch + temps + io per row).
    per_row = (T * 3 * Hp * 2                      # gi_s (bf16)
               + T * Hp * 2                        # hs_s (bf16)
               + (T + 2) * (C + Co) * 4            # at_s + y1_s (f32)
               + T * 3 * Hp * 4                    # f32 gi temporary before bf16 store
               + 3 * T * (C + Co) * 4              # at / y1 / fdta temporaries
               + 4 * T * C * 4)                    # double-buffered zt in + gate out
    Bb, B_pad = _choose_batch_block(B, per_row, budget_bytes=28 << 20)
    nB = B_pad // Bb

    # ---- parameter plumbing (tiny, plain JAX glue) ----
    w_ih = p["gru_w_ih"].astype(jnp.float32)       # (3H, C) rows [r|z|n]
    w_hh = p["gru_w_hh"].astype(jnp.float32)       # (3H, H)
    b_ih = p["gru_b_ih"].astype(jnp.float32)
    b_hh = p["gru_b_hh"].astype(jnp.float32)

    def pack_gate_cols(w):                         # (K, 3H) -> (K, 3Hp), gates at 0/Hp/2Hp
        out = jnp.zeros((w.shape[0], 3 * Hp), jnp.float32)
        for g in range(3):
            out = out.at[:, g * Hp:g * Hp + H].set(w[:, g * H:(g + 1) * H])
        return out

    w_i = pack_gate_cols(jnp.transpose(w_ih)).astype(jnp.bfloat16)        # (C, 3Hp)
    w_h = jnp.zeros((Hp, 3 * Hp), jnp.float32).at[:H, :].set(
        pack_gate_cols(jnp.transpose(w_hh)))                              # (Hp, 3Hp)
    b_fold = jnp.concatenate([b_ih[0:2 * H] + b_hh[0:2 * H],              # r,z folded
                              b_ih[2 * H:3 * H]])
    b_i = pack_gate_cols(b_fold.reshape(1, 3 * H))                        # (1, 3Hp)
    b_hn = jnp.zeros((1, Hp), jnp.float32).at[0, :H].set(b_hh[2 * H:3 * H])
    fc_w = jnp.zeros((Hp, C), jnp.float32).at[:H, :].set(
        jnp.transpose(p["fc_w"].astype(jnp.float32))).astype(jnp.bfloat16)
    fc_b = p["fc_b"].astype(jnp.float32).reshape(1, C)
    c1_w = jnp.transpose(p["conv1_w"][:, :, :, 0].astype(jnp.float32),
                         (2, 1, 0)).astype(jnp.bfloat16)                  # (3, C, Co)
    c1_b = p["conv1_b"].astype(jnp.float32).reshape(1, Co)
    c2_w = jnp.transpose(p["conv2_w"][:, :, :, 0].astype(jnp.float32),
                         (2, 1, 0)).astype(jnp.bfloat16)                  # (3, Co, C)
    c2_b = p["conv2_b"].astype(jnp.float32).reshape(1, C)
    pre_a = p["prelu"].astype(jnp.float32).reshape(1)

    weights = [w_i, w_h, b_i, b_hn, fc_w, fc_b, c1_w, c1_b, c2_w, c2_b]

    def full_spec(a):
        nd = a.ndim
        return pl.BlockSpec(a.shape, lambda i, _nd=nd: (0,) * _nd)

    # ---- kernel 1: zt (B, C, T) ----
    xblk = C * tT * F * itemsize
    ztblk = C * tT * 4
    vmem1 = int(min(max(2 * (xblk + ztblk) + (2 << 20), 16 << 20), 56 << 20))
    zt_bct = pl.pallas_call(
        _zt_kernel,
        out_shape=jax.ShapeDtypeStruct((B, C, T), jnp.float32),
        grid_spec=pltpu.PrefetchScalarGridSpec(
            num_scalar_prefetch=0,
            grid=(B, nT),
            in_specs=[pl.BlockSpec((1, C, tT, F), lambda b, i: (b, 0, i, 0))],
            out_specs=pl.BlockSpec((1, C, tT), lambda b, i: (b, 0, i)),
        ),
        compiler_params=pltpu.CompilerParams(
            dimension_semantics=("parallel", "parallel"),
            vmem_limit_bytes=vmem1),
    )(x)

    # ---- kernel 2: gate (T, B_pad, C) ----
    zt_tbc = jnp.transpose(zt_bct, (2, 0, 1))                             # tiny
    if B_pad > B:
        zt_tbc = jnp.pad(zt_tbc, ((0, 0), (0, B_pad - B), (0, 0)))

    weights_bytes = sum(int(w.size) * w.dtype.itemsize for w in weights)
    vmem2 = int(min(max(weights_bytes + per_row * Bb + (4 << 20), 16 << 20),
                    56 << 20))
    gate_tbc = pl.pallas_call(
        _gate_kernel,
        out_shape=jax.ShapeDtypeStruct((T, B_pad, C), jnp.float32),
        grid_spec=pltpu.PrefetchScalarGridSpec(
            num_scalar_prefetch=0,
            grid=(nB,),
            in_specs=[pl.BlockSpec((T, Bb, C), lambda i: (0, i, 0))]
                     + [full_spec(w) for w in weights]
                     + [pl.BlockSpec(memory_space=pltpu.MemorySpace.SMEM)],
            out_specs=pl.BlockSpec((T, Bb, C), lambda i: (0, i, 0)),
            scratch_shapes=[
                pltpu.VMEM((T * Bb, 3 * Hp), jnp.bfloat16),   # fused gi (r|z|n)
                pltpu.VMEM((T * Bb, Hp), jnp.bfloat16),       # hidden states
                pltpu.VMEM(((T + 2) * Bb, C), jnp.float32),   # padded At
                pltpu.VMEM(((T + 2) * Bb, Co), jnp.float32),  # padded conv1 out
            ],
        ),
        compiler_params=pltpu.CompilerParams(
            dimension_semantics=("parallel",),
            vmem_limit_bytes=vmem2),
    )(zt_tbc, *weights, pre_a)

    gate_bct = jnp.transpose(gate_tbc[:, :B, :], (1, 2, 0))               # (B, C, T) tiny

    # ---- kernel 3: out = x * gate ----
    vmem3 = int(min(max(2 * (2 * xblk + ztblk) + (2 << 20), 16 << 20), 56 << 20))
    out = pl.pallas_call(
        _apply_kernel,
        out_shape=jax.ShapeDtypeStruct((B, C, T, F), x.dtype),
        grid_spec=pltpu.PrefetchScalarGridSpec(
            num_scalar_prefetch=0,
            grid=(B, nT),
            in_specs=[pl.BlockSpec((1, C, tT, F), lambda b, i: (b, 0, i, 0)),
                      pl.BlockSpec((1, C, tT), lambda b, i: (b, 0, i))],
            out_specs=pl.BlockSpec((1, C, tT, F), lambda b, i: (b, 0, i, 0)),
        ),
        compiler_params=pltpu.CompilerParams(
            dimension_semantics=("parallel", "parallel"),
            vmem_limit_bytes=vmem3),
    )(x, gate_bct)

    return out


# ---------------------------------------------------------------------------
# Deterministic parameter construction (matches nn.Module __init__ shapes)
# ---------------------------------------------------------------------------
def make_params(key, C, r=1):
    H = 2 * C
    Co = C * r
    ks = jax.random.split(key, 10)

    def u(k, shape, scale=0.3):
        return jax.random.uniform(k, shape, jnp.float32, -scale, scale)

    return dict(
        gru_w_ih=u(ks[0], (3 * H, C)),
        gru_w_hh=u(ks[1], (3 * H, H)),
        gru_b_ih=u(ks[2], (3 * H,)),
        gru_b_hh=u(ks[3], (3 * H,)),
        fc_w=u(ks[4], (C, H)),
        fc_b=u(ks[5], (C,)),
        conv1_w=u(ks[6], (Co, C, 3, 1)),
        conv1_b=u(ks[7], (Co,)),
        prelu=jnp.array([0.25], jnp.float32),                  # PyTorch default
        conv2_w=u(ks[8], (C, Co, 3, 1)),
        conv2_b=u(ks[9], (C,)),
    )


# ---------------------------------------------------------------------------
# Pure-JAX reference (mirrors the PyTorch cTFA forward) for validation
# ---------------------------------------------------------------------------
def ctfa_reference(x, p):
    B, C, T, F = x.shape
    H = 2 * C
    zt = jnp.mean(x * x, axis=-1)                              # (B, C, T)
    seq = jnp.transpose(zt, (0, 2, 1))                         # (B, T, C)
    w_ih, w_hh = p["gru_w_ih"], p["gru_w_hh"]
    b_ih, b_hh = p["gru_b_ih"], p["gru_b_hh"]

    def cell(h, x_t):
        gi = x_t @ w_ih.T + b_ih
        gh = h @ w_hh.T + b_hh
        i_r, i_z, i_n = jnp.split(gi, 3, axis=-1)
        h_r, h_z, h_n = jnp.split(gh, 3, axis=-1)
        r = jax.nn.sigmoid(i_r + h_r)
        z = jax.nn.sigmoid(i_z + h_z)
        n = jnp.tanh(i_n + r * h_n)
        h_new = (1.0 - z) * n + z * h
        return h_new, h_new

    h0 = jnp.zeros((B, H), jnp.float32)
    _, hs = lax.scan(cell, h0, jnp.transpose(seq, (1, 0, 2)))
    hs = jnp.transpose(hs, (1, 0, 2))                          # (B, T, H)
    at = jax.nn.sigmoid(hs @ p["fc_w"].T + p["fc_b"])          # (B, T, C)
    fita = jnp.transpose(at, (0, 2, 1))[..., None]             # (B, C, T, 1)

    def conv_t(inp, w, b):
        y = lax.conv_general_dilated(
            inp, w, window_strides=(1, 1), padding=((1, 1), (0, 0)),
            dimension_numbers=("NCHW", "OIHW", "NCHW"),
            precision=lax.Precision.HIGHEST)
        return y + b[None, :, None, None]

    y = conv_t(fita, p["conv1_w"], p["conv1_b"])
    y = jnp.where(y >= 0, y, p["prelu"][0] * y)
    y = conv_t(y, p["conv2_w"], p["conv2_b"])
    fdta = jax.nn.sigmoid(y)
    return fita * fdta * x


if __name__ == "__main__":
    key = jax.random.PRNGKey(0)
    kx, kp = jax.random.split(key)
    B, C, T, F = 2, 4, 16, 16                                  # small NCHW shapes
    x = jax.random.normal(kx, (B, C, T, F), jnp.float32)
    params = make_params(kp, C, r=1)

    out = jax.block_until_ready(ctfa_forward(x, params))
    ref = jax.block_until_ready(ctfa_reference(x, params))

    assert out.shape == x.shape
    err = float(jnp.max(jnp.abs(out - ref)))
    # bf16 MXU inputs on the hoisted matmuls (f32 accumulation / activations);
    # gates pass through sigmoid/tanh so the deviation stays small.
    assert err < 2e-2, f"max abs error {err}"
    print("KERNEL_OK")
</pallas_src>

<mosaic_0001>
module attributes {stable_mosaic.version = 11 : i64} {
  func.func @_zt_kernel(%arg0: i32, %arg1: i32, %arg2: memref<1x4x16x16xf32, #tpu.memory_space<vmem>>, %arg3: memref<1x4x16xf32, #tpu.memory_space<vmem>>) attributes {dimension_semantics = [#tpu.dimension_semantics<parallel>, #tpu.dimension_semantics<parallel>], iteration_bounds = array<i64: 2, 1>, scalar_prefetch = 0 : i64, scratch_operands = 0 : i64, tpu.core_type = #tpu.core_type<tc>, window_params = [{transform_indices = @transform_0, window_bounds = array<i64: 1, 4, 16, 16>}, {transform_indices = @transform_1, window_bounds = array<i64: 1, 4, 16>}]} {
    %c0 = arith.constant 0 : index
    %c0_0 = arith.constant 0 : index
    %c0_1 = arith.constant 0 : index
    %c0_2 = arith.constant 0 : index
    %0 = vector.load %arg2[%c0, %c0_0, %c0_1, %c0_2] : memref<1x4x16x16xf32, #tpu.memory_space<vmem>>, vector<1x4x16x16xf32>
    %1 = vector.shape_cast %0 : vector<1x4x16x16xf32> to vector<4x16x16xf32>
    %2 = arith.mulf %1, %1 : vector<4x16x16xf32>
    %cst = arith.constant dense<0.000000e+00> : vector<4x16xf32>
    %3 = vector.multi_reduction <add>, %2, %cst [2] : vector<4x16x16xf32> to vector<4x16xf32>
    %cst_3 = arith.constant 1.600000e+01 : f32
    %4 = vector.broadcast %cst_3 : f32 to vector<4x16xf32>
    %5 = arith.divf %3, %4 : vector<4x16xf32>
    %c0_4 = arith.constant 0 : index
    %c0_5 = arith.constant 0 : index
    %c0_6 = arith.constant 0 : index
    %6 = vector.load %arg3[%c0_4, %c0_5, %c0_6] : memref<1x4x16xf32, #tpu.memory_space<vmem>>, vector<1x4x16xf32>
    %7 = vector.shape_cast %6 : vector<1x4x16xf32> to vector<4x16xf32>
    %8 = vector.shape_cast %5 : vector<4x16xf32> to vector<1x4x16xf32>
    tpu.vector_store %arg3[%c0_4, %c0_5, %c0_6], %8 {strides = array<i32>} : memref<1x4x16xf32, #tpu.memory_space<vmem>>, vector<1x4x16xf32>,
    return
  }
  func.func @transform_0(%arg0: i32, %arg1: i32) -> (i32, i32, i32, i32) {
    %c0_i32 = arith.constant 0 : i32
    %c0_i32_0 = arith.constant 0 : i32
    %c0_i32_1 = arith.constant 0 : i32
    return %arg0, %c0_i32, %arg1, %c0_i32_0 : i32, i32, i32, i32
  }
  func.func @transform_1(%arg0: i32, %arg1: i32) -> (i32, i32, i32) {
    %c0_i32 = arith.constant 0 : i32
    %c0_i32_0 = arith.constant 0 : i32
    return %arg0, %c0_i32, %arg1 : i32, i32, i32
  }
}

</mosaic_0001>

<bundles_post_ra>
// kernel: tpu_custom_call.1
= control target key start
LH: loop header
LB: loop body
LE: loop exit
PB: predicated region body
PF: predicated region fallthrough
CT: control target
= control target key end

     0   :  { %6 = vsyncpa [#allocation3], 0  ;;  %s751_s0 = inlined_call_operand.hbm [shape: f32[2,4,16,16], index: 0, kind: input, shape index: {}]   ;;  %s752_s1 = inlined_call_operand.hbm [shape: f32[2,4,16], index: 1, kind: output, shape index: {}]  }
   0x1   :  { %8 = vsyncpa [#allocation3 + $0x1], 0 }
   0x2   :  { %9 = vsyncpa [#allocation4], 0 }
   0x3   :  { %11 = vsyncpa [#allocation4 + $0x1], 0  ;;  %s565_s6 = smov 0   ;;  %s567_s7 = smov 0  }
   0x4   :  { %s569_s8 = smov 0   ;;  %s571_s9 = smov 0  }
   0x5   :  { %s573_s10 = smov 0   ;;  %s575_s11 = smov 0  }
   0x6 LB: > { %s358_s12 = sadd.s32 4294967295, %s549_s11   ;;  %s359_s13 = sadd.s32 4294967294, %s549_s11   ;;  %s549_s11 = sphi %s575_s11, %s17_s11   ;;  %s545_s10 = sphi %s573_s10, %s767_s10   ;;  %s541_s9 = sphi %s571_s9, %s766_s9   ;;  %s537_s8 = sphi %s569_s8, %s765_s8   ;;  %s533_s7 = sphi %s567_s7, %s764_s7   ;;  %s529_s6 = sphi %s565_s6, %s763_s6  }
   0x7   : > { %s29_s14 = sadd.s32 1, %s545_s10  ;;  %s38_s15 = sadd.s32 1, %s537_s8 }
   0x8   : > { %p31_p0 = scmp.ge.s32.totalorder %s29_s14, 2  ;;  %p45_p1 = scmp.ne.s32.totalorder %s537_s8, %s533_s7 }
   0x9   : > { %p46_p2 = scmp.eq.s32.totalorder %s549_s11, 0  ;;  %p51_p3 = scmp.ne.s32.totalorder %s533_s7, %s529_s6 }
   0xa   : > { %s769_s14 = smov (%p31_p0, %s29_s14), 0  ;;  %p52_p5 = scmp.eq.s32.totalorder %s358_s12, 0 }
   0xb   : > { %p606_p4 = por %p46_p2, %p45_p1  ;;  %s33_s17 = ssub.s32 %s545_s10, %s769_s14 }
   0xc   : > { %p77_p6 = scmp.eq.s32.totalorder %s358_s12, 1  ;;  %p36_p7 = scmp.eq.s32.totalorder %s33_s17, 0 }
   0xd   : > { %p612_p8 = por %p52_p5, %p51_p3  ;;  %p83_p10 = scmp.eq.s32.totalorder %s359_s13, 1 }
   0xe   : > { %p616_p9 = por %p77_p6, %p45_p1  ;;  %p385_p13 = scmp.lt.s32.totalorder %s549_s11, 2 }
   0xf   : > { %s621_s20 = scalar_select %p36_p7, %s537_s8, %s38_s15  }
  0x10   : > { %s756_s19 = scalar_select %p616_p9, 1, 0 }
  0x11   : > { %p623_p11 = por %p83_p10, %p51_p3  ;;  %s103_s22 = sand.u32 1, %s537_s8  }
  0x12   : > { %s362_s23 = sshll.u32 %s103_s22, 6  ;;  %s372_s24 = sshll.u32 %s545_s10, 10 }
  0x13   : > { %s757_s21 = scalar_select %p623_p11, 1, 0 }
  0x14   : > { %s634_s27 = scalar_lea.hbm %s751_s0, %s372_s24  ;;  %s107_s28 = scalar_lea.vmem [#allocation2], %s362_s23 }
  0x15   : > { %s116_s29 = sshll.u32 %s107_s28, 4  ;;  %p640_p0 = pnand %p385_p13, %p606_p4  ;;  %s636_s29 = int_to_ptr.vmem [resolvable:$true] %s116_s29 }
  0x16   : > { %s645_s2 = scalar_lea.sflag [#allocation3], %s103_s22  ;;  %s437_s3 = scalar_lea.hbm %s634_s27, 1024 }
  0x17   : > { %p438_p2 = scmp.ne.s32.totalorder %s634_s27, %s437_s3  ;;  %p439_p3 = pneg %p640_p0 }
  0x18   : > { %s442_s12 = scalar_lea.hbm %s751_s0, 2048  ;;  %p443_p4 = scmp.lt.u32.totalorder %s634_s27, %s751_s0 }
  0x19   : > { %p440_p5 = pnand %p439_p3, %p438_p2  ;;  %p444_p7 = scmp.lt.u32.totalorder %s442_s12, %s437_s3 }
  0x1a   : > { %p446_p13 = scmp.lt.u32.totalorder %s437_s3, %s634_s27 }
  0x1b   : > { %p441_p6 = pneg %p440_p5  ;;  %p445_p10 = por %p444_p7, %p443_p4 }
  0x1d   : > { %p447_p12 = por %p446_p13, %p445_p10 }
  0x1f   : > { %p448_p1 = pnand %p447_p12, %p441_p6 }
  0x21   : > { %451 = shalt.err (!%p448_p1)
}
  0x22   : > { %s452_s16 = scalar_lea.vmem %s636_s29, 1024  ;;  %s551_s17 = smov [#allocation2]  }
  0x23   : > { %p453_p2 = scmp.ne.s32.totalorder %s636_s29, %s452_s16  ;;  %s457_s22 = sshll.u32 %s551_s17, 4  ;;  %s458_s22 = int_to_ptr.vmem [resolvable:$false] %s457_s22 }
  0x24   : > { %s459_s23 = scalar_lea.vmem %s458_s22, 2048  ;;  %p460_p9 = scmp.lt.s32.totalorder %s636_s29, %s458_s22 }
  0x25   : > { %p455_p5 = pnand %p453_p2, %p439_p3  ;;  %p461_p4 = scmp.lt.s32.totalorder %s459_s23, %s452_s16 }
  0x27   : > { %p456_p11 = pneg %p455_p5  ;;  %p462_p7 = por %p461_p4, %p460_p9 }
  0x29   : > { %p463_p10 = pnand %p462_p7, %p456_p11 }
  0x2b   : > { %466 = shalt.err (!%p463_p10)
}
  0x2c   : > { %s552_s24 = smov 128   ;;  %s553_s25 = smov 8  }
  0x2d   : > { %380 = dma.hbm_to_vmem [thread:$0]  (!%p640_p0), %s634_s27, 1024, %s636_s29, %s645_s2, %s552_s24, %s552_s24, %s553_s25  }
  0x2e   : > { %p124_p12 = scmp.lt.s32.totalorder %s549_s11, 3  ;;  %p759_p1 = scmp.ge.s32.totalorder %s549_s11, 1 }
  0x30   : > { %p125_p3 = pnand %p759_p1, %p124_p12 }
  0x31   : > { %s677_s26 = sand.u32 (!%p125_p3), 1, %s533_s7  }
  0x32   : > { %128 = sbr.rel (%p125_p3) target bundleno = 236 (0xec), region = 24  ;;  %s366_s28 = sshll.u32 (!%p125_p3), %s677_s26, 6 }
  0x33   : > { %s131_s3 = scalar_lea.sflag (!%p125_p3), [#allocation3], %s677_s26  ;;  %s134_s4 = scalar_lea.vmem (!%p125_p3), [#allocation2], %s366_s28 }
  0x39   : > { %520 = dma.done.wait (%p612_p8), %s131_s3, 1024  }
  0x3a   : > { %522 = vsyncadd (%p612_p8), %s131_s3, 4294966272  ;;  %v156_v0 = vld [vmem:[%s134_s4 + $0x10] sm:$0xff]  ;;  %vm170_vm0 = vcmask 130048   ;;  %v154_v1 = vld [vmem:[%s134_s4] sm:$0xff]  ;;  %v212_v24 = vlaneseq  ;;  %s367_s18 = sshll.u32 %s677_s26, 2  ;;  %vm223_vm1 = vcmask 130112  }
  0x3b   : > { %v157_v2 = vld [vmem:[%s134_s4 + $0x18] sm:$0xff]  ;;  %v164_v3 = vmul.f32 %v156_v0, %v156_v0  ;;  %v162_v4 = vmul.f32 %v154_v1, %v154_v1  ;;  %v155_v6 = vld [vmem:[%s134_s4 + $0x8] sm:$0xff]  ;;  %v158_v9 = vld [vmem:[%s134_s4 + $0x20] sm:$0xff]  ;;  %vm252_vm2 = vcmask 1041409   ;;  %vm254_vm3 = vcmask 1042434   ;;  %s369_s27 = sshll.u32 %s541_s9, 6 }
  0x3c   : > { %v165_v5 = vmul.f32 %v157_v2, %v157_v2  ;;  %v163_v7 = vmul.f32 %v155_v6, %v155_v6  ;;  %v159_v8 = vld [vmem:[%s134_s4 + $0x28] sm:$0xff]  ;;  %v166_v15 = vmul.f32 %v158_v9, %v158_v9  ;;  %v161_v16 = vld [vmem:[%s134_s4 + $0x38] sm:$0xff]  ;;  %v160_v17 = vld [vmem:[%s134_s4 + $0x30] sm:$0xff]  ;;  %v213_v25 = vand.u32 127, %v212_v24  ;;  %s152_s29 = scalar_lea.vmem [#allocation5], %s367_s18  ;;  %s702_s12 = scalar_lea.hbm %s752_s1, %s369_s27 }
  0x3d   : > { %v177_v10 = vsel %vm170_vm0, %v164_v3, 0.0  ;;  %v171_v11 = vsel %vm170_vm0, %v162_v4, 0.0  ;;  %v167_v14 = vmul.f32 %v159_v8, %v159_v8  ;;  %v169_v20 = vmul.f32 %v161_v16, %v161_v16  ;;  %s276_s30 = sshll.u32 %s152_s29, 4  ;;  %s262_s9 = scalar_lea.sflag [#allocation4], %s677_s26  ;;  %s704_s30 = int_to_ptr.vmem [resolvable:$true] %s276_s30 }
  0x3e   : > { %178 = vadd.xlane.f32.xlu1 %v177_v10  ;;  %172 = vadd.xlane.f32.xlu0 %v171_v11  ;;  %v180_v12 = vsel %vm170_vm0, %v165_v5, 0.0  ;;  %v174_v13 = vsel %vm170_vm0, %v163_v7, 0.0  ;;  %v183_v19 = vsel %vm170_vm0, %v166_v15, 0.0  ;;  %v168_v21 = vmul.f32 %v160_v17, %v160_v17  ;;  %s467_s13 = scalar_lea.vmem %s704_s30, 64  ;;  %p760_p9 = scmp.ne.s32.totalorder %s756_s19, 0 }
  0x3f   : > { %v186_v18 = vsel %vm170_vm0, %v167_v14, 0.0  ;;  %v192_v22 = vsel %vm170_vm0, %v169_v20, 0.0  ;;  %v218_v28 = vadd.s32 4294967288, %v213_v25  ;;  %v215_v29 = vshrl.u32 %v212_v24, 7  ;;  %p468_p8 = scmp.ne.s32.totalorder %s704_s30, %s467_s13  ;;  %s554_s15 = smov [#allocation5]  }
  0x40   : > { %v189_v23 = vsel %vm170_vm0, %v168_v21, 0.0  ;;  %vm256_vm4 = vcmask 1043459   ;;  %vm259_vm5 = vcmask 125952   ;;  %s471_s16 = sshll.u32 %s554_s15, 4  ;;  %s472_s16 = int_to_ptr.vmem [resolvable:$false] %s471_s16 }
  0x41   : > { %v221_v32 = vsub.s32 %v218_v28, %v215_v29  ;;  %v216_v35 = vsub.s32 %v213_v25, %v215_v29  ;;  %p469_p11 = pnand %p468_p8, %p760_p9  ;;  %s473_s17 = scalar_lea.vmem %s472_s16, 128 }
  0x42   : > { %181 = vadd.xlane.f32.xlu1 %v180_v12  ;;  %175 = vadd.xlane.f32.xlu0 %v174_v13  ;;  %p474_p6 = scmp.lt.s32.totalorder %s704_s30, %s472_s16  ;;  %p475_p13 = scmp.lt.s32.totalorder %s473_s17, %s467_s13 }
  0x43   : > { %p470_p0 = pneg %p469_p11 }
  0x44   : > { %p476_p2 = por %p475_p13, %p474_p6 }
  0x46   : > { %187 = vadd.xlane.f32.xlu1 %v186_v18  ;;  %184 = vadd.xlane.f32.xlu0 %v183_v19  ;;  %p477_p5 = pnand %p476_p2, %p470_p0 }
  0x4a   : > { %193 = vadd.xlane.f32.xlu1 %v192_v22  ;;  %190 = vadd.xlane.f32.xlu0 %v189_v23 }
  0xcb   : > { %v179_v26 = vpop.xlane.xlu1 %178  ;;  %v173_v27 = vpop.xlane.xlu0 %172 }
  0xcc   : > { %v198_v36 = vmul.f32 0.0625, %v179_v26  ;;  %v196_v37 = vmul.f32 0.0625, %v173_v27 }
  0xce   : > { %v228_v44 = vrot.slane %v198_v36, %v216_v35  ;;  %v217_v45 = vrot.slane %v196_v37, %v216_v35 }
  0xcf   : > { %v182_v30 = vpop.xlane.xlu1 %181  ;;  %v176_v31 = vpop.xlane.xlu0 %175 }
  0xd0   : > { %v199_v33 = vmul.f32 0.0625, %v182_v30  ;;  %v197_v34 = vmul.f32 0.0625, %v176_v31 }
  0xd2   : > { %v232_v40 = vrot.slane %v199_v33, %v221_v32  ;;  %v222_v41 = vrot.slane %v197_v34, %v221_v32 }
  0xd3   : > { %v188_v38 = vpop.xlane.xlu1 %187  ;;  %v185_v39 = vpop.xlane.xlu0 %184 }
  0xd4   : > { %v201_v42 = vmul.f32 0.0625, %v188_v38  ;;  %v200_v43 = vmul.f32 0.0625, %v185_v39  ;;  %v233_v50 = vsel %vm223_vm1, %v232_v40, %v228_v44  ;;  %v224_v51 = vsel %vm223_vm1, %v222_v41, %v217_v45 }
  0xd5   : > { %v253_v57 = vsel %vm252_vm2, %v233_v50, %v224_v51 }
  0xd6   : > { %v241_v46 = vrot.slane %v201_v42, %v221_v32  ;;  %v237_v47 = vrot.slane %v200_v43, %v216_v35 }
  0xd7   : > { %v194_v48 = vpop.xlane.xlu1 %193  ;;  %v191_v49 = vpop.xlane.xlu0 %190 }
  0xd8   : > { %v203_v52 = vmul.f32 0.0625, %v194_v48  ;;  %v202_v53 = vmul.f32 0.0625, %v191_v49  ;;  %v242_v54 = vsel %vm223_vm1, %v241_v46, %v237_v47 }
  0xd9   : > { %v255_v58 = vsel %vm254_vm3, %v242_v54, %v253_v57 }
  0xda   : > { %v250_v55 = vrot.slane %v203_v52, %v221_v32  ;;  %v246_v56 = vrot.slane %v202_v53, %v216_v35 }
  0xdc   : > { %v251_v59 = vsel %vm223_vm1, %v250_v55, %v246_v56 }
  0xdd   : > { %v257_v60 = vsel %vm256_vm4, %v251_v59, %v255_v58 }
  0xde   : > { %260 = vst.msk [vmem:[%s152_s29] sm:$0xf] %vm259_vm5, %v257_v60 }
  0xdf   : > { %480 = shalt.err (!%p477_p5)
}
  0xe0   : > { %s481_s22 = scalar_lea.hbm %s702_s12, 64  ;;  %s485_s25 = scalar_lea.hbm %s752_s1, 128 }
  0xe1   : > { %p482_p4 = scmp.ne.s32.totalorder %s702_s12, %s481_s22  ;;  %p486_p12 = scmp.lt.u32.totalorder %s702_s12, %s752_s1 }
  0xe2   : > { %p487_p1 = scmp.lt.u32.totalorder %s485_s25, %s481_s22  ;;  %p489_p8 = scmp.lt.u32.totalorder %s481_s22, %s702_s12 }
  0xe3   : > { %p483_p7 = pnand %p482_p4, %p760_p9 }
  0xe4   : > { %p488_p3 = por %p487_p1, %p486_p12 }
  0xe5   : > { %p484_p10 = pneg %p483_p7 }
  0xe6   : > { %p490_p11 = por %p489_p8, %p488_p3 }
  0xe8   : > { %p491_p0 = pnand %p490_p11, %p484_p10 }
  0xea   : > { %494 = shalt.err (!%p491_p0)
}
  0xeb   : > { %375 = dma.vmem_to_hbm [thread:$0]  (%p760_p9), %s704_s30, 64, %s702_s12, %s262_s9  }
  0xec PF: > { %s288_s3 = sand.u32 1, %s529_s6   ;;  %p761_p6 = scmp.ne.s32.totalorder %s757_s21, 0 }
  0xed   : > { %p762_p13 = scmp.ge.s32.totalorder %s549_s11, 2  ;;  %s289_s4 = scalar_lea.sflag [#allocation4], %s288_s3 }
  0xef   : > { %p382_p2 = pnand %p762_p13, %p761_p6 }
  0xf1   : > { %524 = dma.done.wait (!%p382_p2), %s289_s4, 64  }
  0xf2   : > { %526 = vsyncadd (!%p382_p2), %s289_s4, 4294967232  ;;  %s17_s11 = sadd.s32 1, %s549_s11   ;;  %s763_s6 = smov %s533_s7 }
  0xf3   : > { %p14_p5 = scmp.ge.s32.totalorder %s17_s11, 4   ;;  %s764_s7 = smov %s537_s8 }
  0xf4   : > { %s765_s8 = smov %s621_s20  ;;  %s766_s9 = smov %s545_s10 }
  0xf5   : > { %s767_s10 = smov %s769_s14  ;;  %16 = sbr.rel (!%p14_p5) target bundleno = 6 (0x6), region = 69 }
  0xfc   :  { %294 = vsyncpa [#allocation3], 1 }
  0xfd   :  { %296 = vsyncpa [#allocation3 + $0x1], 1 }
  0xfe   :  { %297 = vsyncpa [#allocation4], 1 }
  0xff   :  { %299 = vsyncpa [#allocation4 + $0x1], 1 }

</bundles_post_ra>
